<compile_context>
chip_gen: v7x
topology: tpu7x:2x2x1
jax: 0.10.0
libtpu: 0.0.40
codegen_flags: <defaults>
</compile_context>

<pallas_src>
import functools

import jax
import jax.numpy as jnp
from jax import lax
from jax.experimental import pallas as pl
from jax.experimental.pallas import tpu as pltpu


# ---------------------------------------------------------------------------
# Fused per-tile statistics kernel.
#
# Inputs per grid step (n = batch index, j = pixel tile):
#   z_ref   : (1, C, TP) f32 logits      (C classes on sublanes, TP pixels on lanes)
#   lbl_ref : (1, 1, TP) i32 class labels
# Outputs (VMEM-resident accumulators, one block per batch element):
#   inter_ref: (1, C, 1)  sum_pix softmax_prob * one_hot      (Dice/Jaccard)
#   psum_ref : (1, C, 1)  sum_pix softmax_prob                (Dice/Jaccard)
#   tsum_ref : (1, C, 1)  sum_pix one_hot                     (Dice/Jaccard + mask)
#   fsum_ref : (1, C, 1)  sum_pix focal_loss_with_logits      (Focal)
# ---------------------------------------------------------------------------
def _loss_stats_kernel(z_ref, lbl_ref, inter_ref, psum_ref, tsum_ref, fsum_ref,
                       *, total_pix, alpha, gamma, need_mask):
    j = pl.program_id(1)                      # pixel-tile index (reduction axis)

    z = z_ref[...]                            # (1, C, TP) f32 logits
    lbl = lbl_ref[...]                        # (1, 1, TP) i32 labels
    shape = z.shape
    tile_pix = shape[2]

    # one-vs-all targets; F.one_hot is never materialized in HBM
    cls_ids = lax.broadcasted_iota(jnp.int32, shape, 1)
    t = (lbl == cls_ids).astype(jnp.float32)  # (1, C, TP)

    # softmax over classes (cheap sublane reduction), kept in f32
    m = jnp.max(z, axis=1, keepdims=True)
    e = jnp.exp(z - m)
    p = e / jnp.sum(e, axis=1, keepdims=True)  # (1, C, TP)

    # focal loss with logits; stable BCE-with-logits = softplus(z) - z*t
    softplus = jnp.maximum(z, 0.0) + jnp.log(1.0 + jnp.exp(-jnp.abs(z)))
    logpt = softplus - z * t
    pt = jnp.exp(-logpt)
    d = 1.0 - pt
    focal_term = d * d if gamma == 2.0 else jnp.power(d, gamma)
    alpha_w = (1.0 - alpha) + (2.0 * alpha - 1.0) * t
    focal = focal_term * logpt * alpha_w       # (1, C, TP)

    if need_mask:                              # ragged last pixel tile: mask OOB lanes
        valid = total_pix - j * tile_pix
        lane = lax.broadcasted_iota(jnp.int32, shape, 2)
        keep = lane < valid
        p = jnp.where(keep, p, 0.0)
        t = jnp.where(keep, t, 0.0)
        focal = jnp.where(keep, focal, 0.0)

    @pl.when(j == 0)
    def _():
        inter_ref[...] = jnp.zeros_like(inter_ref)
        psum_ref[...] = jnp.zeros_like(psum_ref)
        tsum_ref[...] = jnp.zeros_like(tsum_ref)
        fsum_ref[...] = jnp.zeros_like(fsum_ref)

    inter_ref[...] += jnp.sum(p * t, axis=2, keepdims=True)
    psum_ref[...] += jnp.sum(p, axis=2, keepdims=True)
    tsum_ref[...] += jnp.sum(t, axis=2, keepdims=True)
    fsum_ref[...] += jnp.sum(focal, axis=2, keepdims=True)


def _pick_pixel_tile(num_pix, max_tile):
    # One full-width block when it fits (always a legal block shape, even if
    # not 128-divisible); otherwise lane-aligned tiles with a masked tail.
    if num_pix <= max_tile:
        return num_pix
    return max(128, (max_tile // 128) * 128)


def combined_loss(y_pred, y_true, *, alpha=0.25, gamma=2.0, smooth=0.0,
                  eps=1e-7, max_pixel_tile=8192):
    """DiceLoss + FocalLoss(alpha=0.25, gamma=2) + JaccardLoss, multiclass, from_logits.

    y_pred: (N, C, H, W) float logits.   y_true: (N, H, W) integer class labels.
    """
    N, C, H, W = y_pred.shape
    P = H * W
    # Free reshapes (no transpose, no HBM copy): pixels land on the lane axis.
    logits = y_pred.reshape(N, C, P).astype(jnp.float32)
    labels = y_true.reshape(N, 1, P).astype(jnp.int32)

    TP = _pick_pixel_tile(P, max_pixel_tile)
    nj = pl.cdiv(P, TP)
    need_mask = (P % TP) != 0

    stat_shape = jax.ShapeDtypeStruct((N, C, 1), jnp.float32)
    stat_spec = pl.BlockSpec((1, C, 1), lambda n, j: (n, 0, 0))

    inter, psum, tsum, fsum = pl.pallas_call(
        functools.partial(_loss_stats_kernel, total_pix=P, alpha=float(alpha),
                          gamma=float(gamma), need_mask=need_mask),
        out_shape=(stat_shape, stat_shape, stat_shape, stat_shape),
        grid_spec=pltpu.PrefetchScalarGridSpec(
            num_scalar_prefetch=0,
            grid=(N, nj),
            in_specs=[
                pl.BlockSpec((1, C, TP), lambda n, j: (n, 0, j)),
                pl.BlockSpec((1, 1, TP), lambda n, j: (n, 0, j)),
            ],
            out_specs=[stat_spec, stat_spec, stat_spec, stat_spec],
        ),
        compiler_params=pltpu.CompilerParams(
            dimension_semantics=("parallel", "arbitrary")),
    )(logits, labels)

    # TODO(synk): this O(num_classes) epilogue (ratios + means over ~C scalars)
    # stays in plain JAX; it is negligible next to the fused per-pixel kernel.
    inter = jnp.sum(inter, axis=(0, 2))        # (C,)
    psum = jnp.sum(psum, axis=(0, 2))
    tsum = jnp.sum(tsum, axis=(0, 2))
    fsum = jnp.sum(fsum, axis=(0, 2))

    card = psum + tsum
    present = (tsum > 0).astype(jnp.float32)   # smp zeroes classes absent in y_true

    dice_score = (2.0 * inter + smooth) / jnp.maximum(card + smooth, eps)
    dice_loss = jnp.mean((1.0 - dice_score) * present)

    union = card - inter
    jaccard_score = (inter + smooth) / jnp.maximum(union + smooth, eps)
    jaccard_loss = jnp.mean((1.0 - jaccard_score) * present)

    focal_loss = jnp.sum(fsum) / float(N * P)  # per-class mean over N*H*W, summed over classes

    return dice_loss + focal_loss + jaccard_loss


# ---------------------------------------------------------------------------
# pure-JAX reference (mirrors the smp loss definitions) for correctness check
# ---------------------------------------------------------------------------
def _reference_combined_loss(y_pred, y_true, *, alpha=0.25, gamma=2.0,
                             smooth=0.0, eps=1e-7):
    N, C = y_pred.shape[:2]
    logits = y_pred.reshape(N, C, -1).astype(jnp.float32)
    labels = y_true.reshape(N, -1)
    prob = jax.nn.softmax(logits, axis=1)
    onehot = jax.nn.one_hot(labels, C, axis=1, dtype=jnp.float32)

    inter = jnp.sum(prob * onehot, axis=(0, 2))
    card = jnp.sum(prob + onehot, axis=(0, 2))
    present = (jnp.sum(onehot, axis=(0, 2)) > 0).astype(jnp.float32)
    dice = jnp.mean((1.0 - (2.0 * inter + smooth)
                     / jnp.maximum(card + smooth, eps)) * present)
    union = card - inter
    jacc = jnp.mean((1.0 - (inter + smooth)
                     / jnp.maximum(union + smooth, eps)) * present)

    logpt = (jnp.maximum(logits, 0.0) - logits * onehot
             + jnp.log1p(jnp.exp(-jnp.abs(logits))))
    pt = jnp.exp(-logpt)
    focal_elem = ((1.0 - pt) ** gamma) * logpt * (alpha * onehot
                                                  + (1.0 - alpha) * (1.0 - onehot))
    focal = jnp.sum(jnp.mean(focal_elem, axis=(0, 2)))
    return dice + focal + jacc


# ---------------------------------------------------------------------------
if __name__ == "__main__":
    key = jax.random.PRNGKey(0)
    k1, k2, k3, k4 = jax.random.split(key, 4)

    # small shapes consistent with the module: 3-class segmentation logits
    N, C, H, W = 2, 3, 16, 16
    y_pred = 2.0 * jax.random.normal(k1, (N, C, H, W), jnp.float32)
    y_true = jax.random.randint(k2, (N, H, W), 0, C, dtype=jnp.int32)

    loss = jax.jit(combined_loss)(y_pred, y_true)
    jax.block_until_ready(loss)
    ref = _reference_combined_loss(y_pred, y_true)
    assert loss.shape == () and loss.dtype == jnp.float32
    assert bool(jnp.isfinite(loss))
    err = abs(float(loss) - float(ref))
    assert err <= 1e-4 * max(1.0, abs(float(ref))), (float(loss), float(ref))

    # Ragged spatial size (H*W = 289) with a small forced pixel tile (128 lanes)
    # to exercise the in-kernel masked-tail path (no HBM padding anywhere).
    Hr = Wr = 17
    y_pred_r = jax.random.normal(k3, (N, C, Hr, Wr), jnp.float32)
    y_true_r = jax.random.randint(k4, (N, Hr, Wr), 0, C, dtype=jnp.int32)
    loss_r = jax.jit(functools.partial(combined_loss, max_pixel_tile=128))(
        y_pred_r, y_true_r)
    jax.block_until_ready(loss_r)
    ref_r = _reference_combined_loss(y_pred_r, y_true_r)
    err_r = abs(float(loss_r) - float(ref_r))
    assert err_r <= 1e-4 * max(1.0, abs(float(ref_r))), (float(loss_r), float(ref_r))

    print("KERNEL_OK")
</pallas_src>

<mosaic_0001>
module attributes {stable_mosaic.version = 11 : i64} {
  func.func @_loss_stats_kernel(%arg0: i32, %arg1: i32, %arg2: memref<1x3x256xf32, #tpu.memory_space<vmem>>, %arg3: memref<1x1x256xi32, #tpu.memory_space<vmem>>, %arg4: memref<1x3x1xf32, #tpu.memory_space<vmem>>, %arg5: memref<1x3x1xf32, #tpu.memory_space<vmem>>, %arg6: memref<1x3x1xf32, #tpu.memory_space<vmem>>, %arg7: memref<1x3x1xf32, #tpu.memory_space<vmem>>) attributes {dimension_semantics = [#tpu.dimension_semantics<parallel>, #tpu.dimension_semantics<arbitrary>], iteration_bounds = array<i64: 2, 1>, scalar_prefetch = 0 : i64, scratch_operands = 0 : i64, tpu.core_type = #tpu.core_type<tc>, window_params = [{transform_indices = @transform_0, window_bounds = array<i64: 1, 3, 256>}, {transform_indices = @transform_1, window_bounds = array<i64: 1, 1, 256>}, {transform_indices = @transform_2, window_bounds = array<i64: 1, 3, 1>}, {transform_indices = @transform_3, window_bounds = array<i64: 1, 3, 1>}, {transform_indices = @transform_4, window_bounds = array<i64: 1, 3, 1>}, {transform_indices = @transform_5, window_bounds = array<i64: 1, 3, 1>}]} {
    %c0 = arith.constant 0 : index
    %c0_0 = arith.constant 0 : index
    %c0_1 = arith.constant 0 : index
    %0 = vector.load %arg2[%c0, %c0_0, %c0_1] : memref<1x3x256xf32, #tpu.memory_space<vmem>>, vector<1x3x256xf32>
    %c0_2 = arith.constant 0 : index
    %c0_3 = arith.constant 0 : index
    %c0_4 = arith.constant 0 : index
    %1 = vector.load %arg3[%c0_2, %c0_3, %c0_4] : memref<1x1x256xi32, #tpu.memory_space<vmem>>, vector<1x1x256xi32>
    %2 = tpu.iota {dimensions = array<i32: 1>} : vector<1x3x256xi32>
    %3 = vector.broadcast %1 : vector<1x1x256xi32> to vector<1x3x256xi32>
    %4 = arith.cmpi eq, %3, %2 : vector<1x3x256xi32>
    %5 = arith.extui %4 : vector<1x3x256xi1> to vector<1x3x256xi32>
    %6 = arith.sitofp %5 : vector<1x3x256xi32> to vector<1x3x256xf32>
    %cst = arith.constant dense<0xFF800000> : vector<1x256xf32>
    %7 = vector.multi_reduction <maximumf>, %0, %cst [1] : vector<1x3x256xf32> to vector<1x256xf32>
    %8 = vector.shape_cast %7 : vector<1x256xf32> to vector<1x1x256xf32>
    %9 = vector.broadcast %8 : vector<1x1x256xf32> to vector<1x3x256xf32>
    %10 = arith.subf %0, %9 : vector<1x3x256xf32>
    %11 = math.exp %10 : vector<1x3x256xf32>
    %cst_5 = arith.constant dense<0.000000e+00> : vector<1x256xf32>
    %12 = vector.multi_reduction <add>, %11, %cst_5 [1] : vector<1x3x256xf32> to vector<1x256xf32>
    %13 = vector.shape_cast %12 : vector<1x256xf32> to vector<1x1x256xf32>
    %14 = vector.broadcast %13 : vector<1x1x256xf32> to vector<1x3x256xf32>
    %15 = arith.divf %11, %14 : vector<1x3x256xf32>
    %cst_6 = arith.constant 0.000000e+00 : f32
    %16 = vector.broadcast %cst_6 : f32 to vector<1x3x256xf32>
    %17 = arith.maximumf %0, %16 : vector<1x3x256xf32>
    %18 = math.absf %0 : vector<1x3x256xf32>
    %cst_7 = arith.constant 0.000000e+00 : f32
    %19 = vector.broadcast %cst_7 : f32 to vector<1x3x256xf32>
    %20 = arith.subf %19, %18 : vector<1x3x256xf32>
    %21 = math.exp %20 : vector<1x3x256xf32>
    %cst_8 = arith.constant 1.000000e+00 : f32
    %22 = vector.broadcast %cst_8 : f32 to vector<1x3x256xf32>
    %23 = arith.addf %22, %21 : vector<1x3x256xf32>
    %24 = math.log %23 : vector<1x3x256xf32>
    %25 = arith.addf %17, %24 : vector<1x3x256xf32>
    %26 = arith.mulf %0, %6 : vector<1x3x256xf32>
    %27 = arith.subf %25, %26 : vector<1x3x256xf32>
    %cst_9 = arith.constant 0.000000e+00 : f32
    %28 = vector.broadcast %cst_9 : f32 to vector<1x3x256xf32>
    %29 = arith.subf %28, %27 : vector<1x3x256xf32>
    %30 = math.exp %29 : vector<1x3x256xf32>
    %cst_10 = arith.constant 1.000000e+00 : f32
    %31 = vector.broadcast %cst_10 : f32 to vector<1x3x256xf32>
    %32 = arith.subf %31, %30 : vector<1x3x256xf32>
    %33 = arith.mulf %32, %32 : vector<1x3x256xf32>
    %cst_11 = arith.constant -5.000000e-01 : f32
    %34 = vector.broadcast %cst_11 : f32 to vector<1x3x256xf32>
    %35 = arith.mulf %34, %6 : vector<1x3x256xf32>
    %cst_12 = arith.constant 7.500000e-01 : f32
    %36 = vector.broadcast %cst_12 : f32 to vector<1x3x256xf32>
    %37 = arith.addf %36, %35 : vector<1x3x256xf32>
    %38 = arith.mulf %33, %27 : vector<1x3x256xf32>
    %39 = arith.mulf %38, %37 : vector<1x3x256xf32>
    %c0_i32 = arith.constant 0 : i32
    %40 = arith.cmpi eq, %arg1, %c0_i32 : i32
    %41 = arith.extui %40 : i1 to i32
    %c0_i32_13 = arith.constant 0 : i32
    %42 = arith.cmpi ne, %41, %c0_i32_13 : i32
    scf.if %42 {
      %cst_42 = arith.constant 0.000000e+00 : f32
      %64 = vector.broadcast %cst_42 : f32 to vector<1x3x1xf32>
      %c0_43 = arith.constant 0 : index
      %c0_44 = arith.constant 0 : index
      %c0_45 = arith.constant 0 : index
      %65 = vector.load %arg4[%c0_43, %c0_44, %c0_45] : memref<1x3x1xf32, #tpu.memory_space<vmem>>, vector<1x3x1xf32>
      tpu.vector_store %arg4[%c0_43, %c0_44, %c0_45], %64 {strides = array<i32>} : memref<1x3x1xf32, #tpu.memory_space<vmem>>, vector<1x3x1xf32>,
      %cst_46 = arith.constant 0.000000e+00 : f32
      %66 = vector.broadcast %cst_46 : f32 to vector<1x3x1xf32>
      %c0_47 = arith.constant 0 : index
      %c0_48 = arith.constant 0 : index
      %c0_49 = arith.constant 0 : index
      %67 = vector.load %arg5[%c0_47, %c0_48, %c0_49] : memref<1x3x1xf32, #tpu.memory_space<vmem>>, vector<1x3x1xf32>
      tpu.vector_store %arg5[%c0_47, %c0_48, %c0_49], %66 {strides = array<i32>} : memref<1x3x1xf32, #tpu.memory_space<vmem>>, vector<1x3x1xf32>,
      %cst_50 = arith.constant 0.000000e+00 : f32
      %68 = vector.broadcast %cst_50 : f32 to vector<1x3x1xf32>
      %c0_51 = arith.constant 0 : index
      %c0_52 = arith.constant 0 : index
      %c0_53 = arith.constant 0 : index
      %69 = vector.load %arg6[%c0_51, %c0_52, %c0_53] : memref<1x3x1xf32, #tpu.memory_space<vmem>>, vector<1x3x1xf32>
      tpu.vector_store %arg6[%c0_51, %c0_52, %c0_53], %68 {strides = array<i32>} : memref<1x3x1xf32, #tpu.memory_space<vmem>>, vector<1x3x1xf32>,
      %cst_54 = arith.constant 0.000000e+00 : f32
      %70 = vector.broadcast %cst_54 : f32 to vector<1x3x1xf32>
      %c0_55 = arith.constant 0 : index
      %c0_56 = arith.constant 0 : index
      %c0_57 = arith.constant 0 : index
      %71 = vector.load %arg7[%c0_55, %c0_56, %c0_57] : memref<1x3x1xf32, #tpu.memory_space<vmem>>, vector<1x3x1xf32>
      tpu.vector_store %arg7[%c0_55, %c0_56, %c0_57], %70 {strides = array<i32>} : memref<1x3x1xf32, #tpu.memory_space<vmem>>, vector<1x3x1xf32>,
    } else {
    }
    %c0_14 = arith.constant 0 : index
    %c0_15 = arith.constant 0 : index
    %c0_16 = arith.constant 0 : index
    %43 = vector.load %arg4[%c0_14, %c0_15, %c0_16] : memref<1x3x1xf32, #tpu.memory_space<vmem>>, vector<1x3x1xf32>
    %44 = arith.mulf %15, %6 : vector<1x3x256xf32>
    %cst_17 = arith.constant dense<0.000000e+00> : vector<1x3xf32>
    %45 = vector.multi_reduction <add>, %44, %cst_17 [2] : vector<1x3x256xf32> to vector<1x3xf32>
    %46 = vector.shape_cast %45 : vector<1x3xf32> to vector<1x3x1xf32>
    %47 = arith.addf %43, %46 : vector<1x3x1xf32>
    %c0_18 = arith.constant 0 : index
    %c0_19 = arith.constant 0 : index
    %c0_20 = arith.constant 0 : index
    %48 = vector.load %arg4[%c0_18, %c0_19, %c0_20] : memref<1x3x1xf32, #tpu.memory_space<vmem>>, vector<1x3x1xf32>
    tpu.vector_store %arg4[%c0_18, %c0_19, %c0_20], %47 {strides = array<i32>} : memref<1x3x1xf32, #tpu.memory_space<vmem>>, vector<1x3x1xf32>,
    %c0_21 = arith.constant 0 : index
    %c0_22 = arith.constant 0 : index
    %c0_23 = arith.constant 0 : index
    %49 = vector.load %arg5[%c0_21, %c0_22, %c0_23] : memref<1x3x1xf32, #tpu.memory_space<vmem>>, vector<1x3x1xf32>
    %cst_24 = arith.constant dense<0.000000e+00> : vector<1x3xf32>
    %50 = vector.multi_reduction <add>, %15, %cst_24 [2] : vector<1x3x256xf32> to vector<1x3xf32>
    %51 = vector.shape_cast %50 : vector<1x3xf32> to vector<1x3x1xf32>
    %52 = arith.addf %49, %51 : vector<1x3x1xf32>
    %c0_25 = arith.constant 0 : index
    %c0_26 = arith.constant 0 : index
    %c0_27 = arith.constant 0 : index
    %53 = vector.load %arg5[%c0_25, %c0_26, %c0_27] : memref<1x3x1xf32, #tpu.memory_space<vmem>>, vector<1x3x1xf32>
    tpu.vector_store %arg5[%c0_25, %c0_26, %c0_27], %52 {strides = array<i32>} : memref<1x3x1xf32, #tpu.memory_space<vmem>>, vector<1x3x1xf32>,
    %c0_28 = arith.constant 0 : index
    %c0_29 = arith.constant 0 : index
    %c0_30 = arith.constant 0 : index
    %54 = vector.load %arg6[%c0_28, %c0_29, %c0_30] : memref<1x3x1xf32, #tpu.memory_space<vmem>>, vector<1x3x1xf32>
    %cst_31 = arith.constant dense<0.000000e+00> : vector<1x3xf32>
    %55 = vector.multi_reduction <add>, %6, %cst_31 [2] : vector<1x3x256xf32> to vector<1x3xf32>
    %56 = vector.shape_cast %55 : vector<1x3xf32> to vector<1x3x1xf32>
    %57 = arith.addf %54, %56 : vector<1x3x1xf32>
    %c0_32 = arith.constant 0 : index
    %c0_33 = arith.constant 0 : index
    %c0_34 = arith.constant 0 : index
    %58 = vector.load %arg6[%c0_32, %c0_33, %c0_34] : memref<1x3x1xf32, #tpu.memory_space<vmem>>, vector<1x3x1xf32>
    tpu.vector_store %arg6[%c0_32, %c0_33, %c0_34], %57 {strides = array<i32>} : memref<1x3x1xf32, #tpu.memory_space<vmem>>, vector<1x3x1xf32>,
    %c0_35 = arith.constant 0 : index
    %c0_36 = arith.constant 0 : index
    %c0_37 = arith.constant 0 : index
    %59 = vector.load %arg7[%c0_35, %c0_36, %c0_37] : memref<1x3x1xf32, #tpu.memory_space<vmem>>, vector<1x3x1xf32>
    %cst_38 = arith.constant dense<0.000000e+00> : vector<1x3xf32>
    %60 = vector.multi_reduction <add>, %39, %cst_38 [2] : vector<1x3x256xf32> to vector<1x3xf32>
    %61 = vector.shape_cast %60 : vector<1x3xf32> to vector<1x3x1xf32>
    %62 = arith.addf %59, %61 : vector<1x3x1xf32>
    %c0_39 = arith.constant 0 : index
    %c0_40 = arith.constant 0 : index
    %c0_41 = arith.constant 0 : index
    %63 = vector.load %arg7[%c0_39, %c0_40, %c0_41] : memref<1x3x1xf32, #tpu.memory_space<vmem>>, vector<1x3x1xf32>
    tpu.vector_store %arg7[%c0_39, %c0_40, %c0_41], %62 {strides = array<i32>} : memref<1x3x1xf32, #tpu.memory_space<vmem>>, vector<1x3x1xf32>,
    return
  }
  func.func @transform_0(%arg0: i32, %arg1: i32) -> (i32, i32, i32) {
    %c0_i32 = arith.constant 0 : i32
    %c0_i32_0 = arith.constant 0 : i32
    return %arg0, %c0_i32, %arg1 : i32, i32, i32
  }
  func.func @transform_1(%arg0: i32, %arg1: i32) -> (i32, i32, i32) {
    %c0_i32 = arith.constant 0 : i32
    %c0_i32_0 = arith.constant 0 : i32
    return %arg0, %c0_i32, %arg1 : i32, i32, i32
  }
  func.func @transform_2(%arg0: i32, %arg1: i32) -> (i32, i32, i32) {
    %c0_i32 = arith.constant 0 : i32
    %c0_i32_0 = arith.constant 0 : i32
    %c0_i32_1 = arith.constant 0 : i32
    return %arg0, %c0_i32, %c0_i32_0 : i32, i32, i32
  }
  func.func @transform_3(%arg0: i32, %arg1: i32) -> (i32, i32, i32) {
    %c0_i32 = arith.constant 0 : i32
    %c0_i32_0 = arith.constant 0 : i32
    %c0_i32_1 = arith.constant 0 : i32
    return %arg0, %c0_i32, %c0_i32_0 : i32, i32, i32
  }
  func.func @transform_4(%arg0: i32, %arg1: i32) -> (i32, i32, i32) {
    %c0_i32 = arith.constant 0 : i32
    %c0_i32_0 = arith.constant 0 : i32
    %c0_i32_1 = arith.constant 0 : i32
    return %arg0, %c0_i32, %c0_i32_0 : i32, i32, i32
  }
  func.func @transform_5(%arg0: i32, %arg1: i32) -> (i32, i32, i32) {
    %c0_i32 = arith.constant 0 : i32
    %c0_i32_0 = arith.constant 0 : i32
    %c0_i32_1 = arith.constant 0 : i32
    return %arg0, %c0_i32, %c0_i32_0 : i32, i32, i32
  }
}

</mosaic_0001>

<bundles_post_ra>
// kernel: combined_loss.1
= control target key start
LH: loop header
LB: loop body
LE: loop exit
PB: predicated region body
PF: predicated region fallthrough
CT: control target
= control target key end

     0   :  { %s746_s18 = smov 0   ;;  %s748_s19 = smov 0   ;;  %s833_s0 = inlined_call_operand.vmem [shape: f32[2,3,256], index: 0, kind: input, shape index: {}]   ;;  %s834_s1 = inlined_call_operand.vmem [shape: s32[2,1,256], index: 1, kind: input, shape index: {}]   ;;  %s835_s2 = inlined_call_operand.vmem [shape: f32[2,3,1], index: 2, kind: output, shape index: {0}]   ;;  %s836_s3 = inlined_call_operand.vmem [shape: f32[2,3,1], index: 3, kind: output, shape index: {1}]   ;;  %s837_s4 = inlined_call_operand.vmem [shape: f32[2,3,1], index: 4, kind: output, shape index: {2}]   ;;  %s838_s5 = inlined_call_operand.vmem [shape: f32[2,3,1], index: 5, kind: output, shape index: {3}]  }
   0x1   :  { %s750_s20 = smov 0  }
   0x2 LB: > { %s28_s21 = sadd.s32 1, %s709_s19  ;;  %p642_p0 = scmp.ge.s32.totalorder %s713_s20, 1  ;;  %s713_s20 = sphi %s750_s20, %s16_s20   ;;  %s709_s19 = sphi %s748_s19, %s840_s19   ;;  %s705_s18 = sphi %s746_s18, %s839_s18  }
   0x3   : > { %p30_p1 = scmp.ge.s32.totalorder %s28_s21, 2  ;;  %p229_p2 = scmp.lt.s32.totalorder %s713_s20, 3 }
   0x5   : > { %s842_s21 = smov (%p30_p1, %s28_s21), 0  ;;  %p230_p3 = pnand %p642_p0, %p229_p2 }
   0x6   : > { %p281_p4 = scmp.lt.s32.totalorder (!%p230_p3), %s705_s18, 1  ;;  %v317_v0 = vlaneseq (!%p230_p3)  ;;  %vm336_vm0 = vcmask (!%p230_p3), 1042432   ;;  %vm415_vm1 = vcmask (!%p230_p3), 2048   ;;  %v715_v11 = vmov (!%p230_p3), 0.0  }
   0x7   : > { %233 = sbr.rel (%p230_p3) target bundleno = 237 (0xed), region = 28 }
   0x8   : > { %v318_v1 = vshrl.u32 (!%p230_p3), %v317_v0, 7 }
   0xa   : > { %v321_v2 = vsub.s32 (!%p230_p3), 0, %v318_v1  ;;  %v325_v3 = vsub.s32 (!%p230_p3), 1, %v318_v1 }
   0xe   : > { %s844_s18 = smov (!%p281_p4, %s705_s18), 1 }
   0xf   : > { %s645_s22 = sshll.u32 %s844_s18, 1  ;;  %s654_s23 = sshll.u32 %s844_s18, 3 }
  0x10   : > { %s297_s26 = scalar_lea.vmem %s834_s1, %s645_s22  ;;  %s288_s29 = scalar_lea.vmem %s833_s0, %s654_s23 }
  0x11   : > { %v316_v4 = vld [vmem:[%s297_s26] sm:$0x3]  ;;  %s770_s30 = sshll.u32 %s844_s18, 2 }
  0x12   : > { %v315_v5 = vld [vmem:[%s288_s29] sm:$0x77]  ;;  %v322_v6 = vrot.slane %v316_v4, %v321_v2  ;;  %v326_v7 = vrot.slane %v316_v4, %v325_v3  ;;  %s777_s8 = scalar_lea.vmem %s837_s4, %s770_s30  ;;  %s791_s11 = scalar_lea.vmem %s835_s2, %s770_s30 }
  0x13   : > { %v334_v8 = vcombine.high %v315_v5, %v315_v5  ;;  %v337_v9 = vsel %vm336_vm0, %v315_v5, -inf  ;;  %418 = vst.msk [vmem:[%s777_s8] sm:$0x7] %vm415_vm1, %v715_v11  ;;  %v382_v13 = vand.u32 2147483647, %v315_v5  ;;  %v381_v41 = vmax.f32 %v315_v5, 0.0  ;;  %s314_s14 = scalar_lea.vmem %s838_s5, %s770_s30  ;;  %s306_s17 = scalar_lea.vmem %s836_s3, %s770_s30 }
  0x14   : > { %v338_v10 = vrot.slane %v337_v9, 4  ;;  %vm327_vm2 = vcmp.eq.s32.totalorder %v322_v6, %v318_v1  ;;  %vm328_vm3 = vcmp.eq.s32.totalorder %v326_v7, %v318_v1  ;;  %416 = vst.msk [vmem:[%s791_s11] sm:$0x7] %vm415_vm1, %v715_v11  ;;  %419 = vst.msk [vmem:[%s314_s14] sm:$0x7] %vm415_vm1, %v715_v11 }
  0x15   : > { %v344_v12 = vsel %vm336_vm0, %v334_v8, -inf  ;;  %v650_v14 = vsel %vm327_vm2, 1.0, %v715_v11  ;;  %v651_v15 = vsel %vm328_vm3, 1.0, %v715_v11  ;;  %v383_v23 = vsub.f32 0.0, %v382_v13  ;;  %417 = vst.msk [vmem:[%s306_s17] sm:$0x7] %vm415_vm1, %v715_v11 }
  0x16   : > { %v339_v16 = vmax.f32 %v337_v9, %v338_v10  ;;  %v345_v17 = vrot.slane %v344_v12, 4  ;;  %v445_v18 = vsel %vm336_vm0, %v650_v14, 0.0  ;;  %v446_v19 = vsel %vm336_vm0, %v651_v15, 0.0 }
  0x17   : > { %v447_v20 = vadd.f32 %v446_v19, %v445_v18  ;;  %v384_v26 = vmul.f32 1.442695, %v383_v23  ;;  %v392_v37 = vcombine.low %v650_v14, %v651_v15  ;;  %v402_v63 = vmul.f32 -0.5, %v651_v15 }
  0x18   : > { %v340_v21 = vrot.slane %v339_v16, 2  ;;  %v346_v22 = vmax.f32 %v344_v12, %v345_v17  ;;  %v401_v0 = vmul.f32 -0.5, %v650_v14 }
  0x19   : > { %448 = vadd.xlane.f32.xlu1 %v447_v20  ;;  %681 = vpow2.f32 %v384_v26  ;;  %v394_v45 = vmul.f32 %v392_v37, %v315_v5  ;;  %v404_v1 = vadd.f32 0.75, %v402_v63 }
  0x1a   : > { %v341_v24 = vmax.f32 %v339_v16, %v340_v21  ;;  %v347_v25 = vrot.slane %v346_v22, 2  ;;  %v403_v2 = vadd.f32 0.75, %v401_v0 }
  0x1c   : > { %v342_v27 = vrot.slane %v341_v24, 1  ;;  %v348_v28 = vmax.f32 %v346_v22, %v347_v25  ;;  %v408_v6 = vcombine.low %v403_v2, %v404_v1  ;;  %v444_v25 = vld [vmem:[%s777_s8] sm:$0x7] }
  0x1e   : > { %v343_v29 = vmax.f32 %v341_v24, %v342_v27  ;;  %v349_v30 = vrot.slane %v348_v28, 1 }
  0x20   : > { %v350_v31 = vmax.f32 %v348_v28, %v349_v30  ;;  %v452_v28 = vld [vmem:[%s314_s14] sm:$0x7] }
  0x22   : > { %v353_v32 = vcombine.low %v343_v29, %v350_v31  ;;  %v420_v29 = vld [vmem:[%s791_s11] sm:$0x7] }
  0x23   : > { %v682_v35 = vpop.eup %681 }
  0x24   : > { %v355_v33 = vsub.f32 %v315_v5, %v353_v32  ;;  %v386_v36 = vadd.f32 1.0, %v682_v35 }
  0x26   : > { %v356_v34 = vmul.f32 1.442695, %v355_v33 }
  0x28   : > { %683 = vpow2.f32 %v356_v34  ;;  %v433_v34 = vld [vmem:[%s306_s17] sm:$0x7] }
  0x29   : > { %685 = vlog2.f32 %v386_v36 }
  0x32   : > { %v684_v38 = vpop.eup %683 }
  0x33   : > { %v359_v39 = vcombine.high %v684_v38, %v684_v38  ;;  %v361_v40 = vsel %vm336_vm0, %v684_v38, 0.0  ;;  %v686_v42 = vpop.eup %685 }
  0x34   : > { %v362_v43 = vrot.slane %v361_v40, 4  ;;  %v388_v46 = vmul.f32 0.6931472, %v686_v42 }
  0x35   : > { %v368_v44 = vsel %vm336_vm0, %v359_v39, 0.0 }
  0x36   : > { %v363_v47 = vadd.f32 %v362_v43, %v361_v40  ;;  %v369_v48 = vrot.slane %v368_v44, 4  ;;  %v389_v49 = vadd.f32 %v388_v46, %v381_v41 }
  0x38   : > { %v364_v50 = vrot.slane %v363_v47, 2  ;;  %v370_v51 = vadd.f32 %v369_v48, %v368_v44  ;;  %v395_v52 = vsub.f32 %v389_v49, %v394_v45 }
  0x3a   : > { %v365_v53 = vadd.f32 %v364_v50, %v363_v47  ;;  %v371_v54 = vrot.slane %v370_v51, 2  ;;  %v396_v55 = vsub.f32 0.0, %v395_v52 }
  0x3c   : > { %v366_v56 = vrot.slane %v365_v53, 1  ;;  %v372_v57 = vadd.f32 %v371_v54, %v370_v51  ;;  %v397_v58 = vmul.f32 1.442695, %v396_v55 }
  0x3e   : > { %v367_v59 = vadd.f32 %v366_v56, %v365_v53  ;;  %v373_v60 = vrot.slane %v372_v57, 1  ;;  %687 = vpow2.f32 %v397_v58 }
  0x40   : > { %v374_v61 = vadd.f32 %v373_v60, %v372_v57 }
  0x42   : > { %v377_v62 = vcombine.low %v367_v59, %v374_v61 }
  0x44   : > { %689 = vrcp.f32 %v377_v62 }
  0x48   : > { %v688_v3 = vpop.eup %687 }
  0x49   : > { %v399_v4 = vsub.f32 1.0, %v688_v3 }
  0x4b   : > { %v400_v5 = vmul.f32 %v399_v4, %v399_v4 }
  0x4d   : > { %v405_v8 = vmul.f32 %v400_v5, %v395_v52 }
  0x4e   : > { %v690_v7 = vpop.eup %689 }
  0x4f   : > { %v380_v9 = vmul.f32 %v690_v7, %v684_v38  ;;  %v410_v10 = vmul.f32 %v408_v6, %v405_v8 }
  0x51   : > { %v421_v12 = vmul.f32 %v392_v37, %v380_v9  ;;  %v435_v13 = vcombine.high %v380_v9, %v380_v9  ;;  %v454_v16 = vcombine.high %v410_v10, %v410_v10  ;;  %v456_v17 = vsel %vm336_vm0, %v410_v10, 0.0 }
  0x52   : > { %v437_v21 = vsel %vm336_vm0, %v380_v9, 0.0 }
  0x53   : > { %v423_v15 = vcombine.high %v421_v12, %v421_v12  ;;  %v425_v14 = vsel %vm336_vm0, %v421_v12, 0.0  ;;  %v457_v18 = vsel %vm336_vm0, %v454_v16, 0.0  ;;  %v438_v22 = vsel %vm336_vm0, %v435_v13, 0.0 }
  0x54   : > { %v458_v20 = vadd.f32 %v457_v18, %v456_v17  ;;  %v439_v24 = vadd.f32 %v438_v22, %v437_v21 }
  0x55   : > { %v426_v19 = vsel %vm336_vm0, %v423_v15, 0.0 }
  0x56   : > { %v427_v23 = vadd.f32 %v426_v19, %v425_v14  ;;  %459 = vadd.xlane.f32.xlu1 %v458_v20 }
  0x58   : > { %428 = vadd.xlane.f32.xlu0 %v427_v23 }
  0x5c   : > { %440 = vadd.xlane.f32.xlu0 %v439_v24 }
  0xa6   : > { %v449_v26 = vpop.xlane.xlu1 %448 }
  0xa7   : > { %v450_v27 = vadd.f32 %v449_v26, %v444_v25 }
  0xa9   : > { %451 = vst.msk [vmem:[%s777_s8] sm:$0x7] %vm415_vm1, %v450_v27 }
  0xe3   : > { %v460_v30 = vpop.xlane.xlu1 %459 }
  0xe4   : > { %v461_v32 = vadd.f32 %v460_v30, %v452_v28 }
  0xe5   : > { %v429_v31 = vpop.xlane.xlu0 %428 }
  0xe6   : > { %v430_v33 = vadd.f32 %v429_v31, %v420_v29  ;;  %462 = vst.msk [vmem:[%s314_s14] sm:$0x7] %vm415_vm1, %v461_v32 }
  0xe8   : > { %432 = vst.msk [vmem:[%s791_s11] sm:$0x7] %vm415_vm1, %v430_v33 }
  0xe9   : > { %v441_v35 = vpop.xlane.xlu0 %440 }
  0xea   : > { %v442_v36 = vadd.f32 %v441_v35, %v433_v34 }
  0xec   : > { %443 = vst.msk [vmem:[%s306_s17] sm:$0x7] %vm415_vm1, %v442_v36 }
  0xed PF: > { %s16_s20 = sadd.s32 1, %s713_s20   ;;  %s839_s18 = smov %s709_s19 }
  0xee   : > { %p13_p5 = scmp.ge.s32.totalorder %s16_s20, 4   ;;  %s840_s19 = smov %s842_s21 }
  0xf0   :  { %15 = sbr.rel (!%p13_p5) target bundleno = 2 (0x2), region = 101 }

</bundles_post_ra>
